<compile_context>
chip_gen: v6e
topology: v6e:2x2x1
jax: 0.10.0
libtpu: 0.0.40
codegen_flags: <defaults>
</compile_context>

<pallas_src>
import jax
import jax.numpy as jnp
from jax.experimental import pallas as pl
from jax.experimental.pallas import tpu as pltpu

IN_FEATURES = 768
HIDDEN = 256
OUT_FEATURES = 1


def _round_up(x, m):
    return (x + m - 1) // m * m


def _head_kernel(x_ref, w1_ref, b1_ref, w2_ref, b2_ref, o_ref):
    # x:  [TB, 768] bf16      w1: [768, 256] bf16    b1: [1, 256] f32 (VMEM)
    # w2: [1, 256]  f32 (VMEM) b2: [1] f32 (SMEM)    o:  [TB, 1] f32
    # Linear(768 -> 256) on the MXU, f32 accumulation, + bias, ReLU.
    h = jnp.dot(x_ref[...], w1_ref[...], preferred_element_type=jnp.float32)
    h = jnp.maximum(h + b1_ref[...], 0.0)
    # Linear(256 -> 1): VPU multiply + lane reduce (avoids a 1-column MXU op).
    logit = jnp.sum(h * w2_ref[...], axis=-1, keepdims=True) + b2_ref[0]
    o_ref[...] = jax.nn.sigmoid(logit).astype(o_ref.dtype)


def classification_head(x, w1, b1, w2, b2, *, tile_b=512):
    """x: [B, 768]; w1: [768, 256]; b1: [256]; w2: [256, 1]; b2: [1].
    Returns [B, 1] f32 sigmoid probabilities."""
    B = x.shape[0]
    tb = min(tile_b, _round_up(B, 8))          # small batches: one small tile
    Bp = _round_up(B, tb)                      # pad batch to a tile multiple
    n_tiles = Bp // tb

    x_bf = x.astype(jnp.bfloat16)
    if Bp != B:
        x_bf = jnp.pad(x_bf, ((0, Bp - B), (0, 0)))
    w1_bf = w1.astype(jnp.bfloat16)
    b1_2d = b1.reshape(1, HIDDEN).astype(jnp.float32)
    w2_row = w2.reshape(1, HIDDEN).astype(jnp.float32)   # (256,1) -> (1,256)
    b2_1d = b2.reshape(OUT_FEATURES).astype(jnp.float32)  # SMEM scalar

    cost = pl.CostEstimate(
        flops=2 * Bp * IN_FEATURES * HIDDEN + 3 * Bp * HIDDEN,
        transcendentals=Bp,
        bytes_accessed=(Bp * IN_FEATURES * 2 + IN_FEATURES * HIDDEN * 2
                        + 2 * HIDDEN * 4 + 4 + Bp * 4),
    )

    out = pl.pallas_call(
        _head_kernel,
        out_shape=jax.ShapeDtypeStruct((Bp, OUT_FEATURES), jnp.float32),
        grid_spec=pltpu.PrefetchScalarGridSpec(
            num_scalar_prefetch=0,
            grid=(n_tiles,),
            in_specs=[
                pl.BlockSpec((tb, IN_FEATURES), lambda i: (i, 0)),
                pl.BlockSpec((IN_FEATURES, HIDDEN), lambda i: (0, 0)),
                pl.BlockSpec((1, HIDDEN), lambda i: (0, 0)),
                pl.BlockSpec((1, HIDDEN), lambda i: (0, 0)),
                pl.BlockSpec(memory_space=pltpu.MemorySpace.SMEM),
            ],
            out_specs=pl.BlockSpec((tb, OUT_FEATURES), lambda i: (i, 0)),
        ),
        compiler_params=pltpu.CompilerParams(
            dimension_semantics=("parallel",),
            vmem_limit_bytes=32 * 1024 * 1024,
        ),
        cost_estimate=cost,
    )(x_bf, w1_bf, b1_2d, w2_row, b2_1d)
    return out[:B]


def init_params(key):
    """Matches ClassificationHead.init_weights: W ~ N(0, 1/sqrt(in)), b = 0.
    Weights stored as [in, out] (transposed vs. PyTorch) for x @ W."""
    k1, k2 = jax.random.split(key)
    w1 = (jax.random.normal(k1, (IN_FEATURES, HIDDEN), jnp.float32)
          / jnp.sqrt(float(IN_FEATURES)))
    b1 = jnp.zeros((HIDDEN,), jnp.float32)
    w2 = (jax.random.normal(k2, (HIDDEN, OUT_FEATURES), jnp.float32)
          / jnp.sqrt(float(HIDDEN)))
    b2 = jnp.zeros((OUT_FEATURES,), jnp.float32)
    return w1, b1, w2, b2


def reference(x, w1, b1, w2, b2):
    h = jnp.maximum(x @ w1 + b1, 0.0)
    return jax.nn.sigmoid(h @ w2 + b2)


if __name__ == "__main__":
    key = jax.random.PRNGKey(0)
    kx1, kx2, kp = jax.random.split(key, 3)
    w1, b1, w2, b2 = init_params(kp)

    # Test 1: small batch, single tile.
    B1 = 8
    x1 = jax.random.normal(kx1, (B1, IN_FEATURES), jnp.float32)
    out1 = jax.block_until_ready(classification_head(x1, w1, b1, w2, b2))
    ref1 = reference(x1, w1, b1, w2, b2)
    assert out1.shape == (B1, OUT_FEATURES), out1.shape
    assert jnp.allclose(out1, ref1, atol=2e-2, rtol=2e-2), (
        f"max abs err = {jnp.max(jnp.abs(out1 - ref1))}")

    # Test 2: multi-tile path with batch padding (B=20, tile_b=8 -> 3 tiles).
    B2 = 20
    x2 = jax.random.normal(kx2, (B2, IN_FEATURES), jnp.float32)
    out2 = jax.block_until_ready(
        classification_head(x2, w1, b1, w2, b2, tile_b=8))
    ref2 = reference(x2, w1, b1, w2, b2)
    assert out2.shape == (B2, OUT_FEATURES), out2.shape
    assert jnp.allclose(out2, ref2, atol=2e-2, rtol=2e-2), (
        f"max abs err = {jnp.max(jnp.abs(out2 - ref2))}")

    print("KERNEL_OK")
</pallas_src>

<mosaic_0001>
module attributes {stable_mosaic.version = 11 : i64} {
  func.func @_head_kernel(%arg0: i32, %arg1: memref<8x768xbf16, #tpu.memory_space<vmem>>, %arg2: memref<768x256xbf16, #tpu.memory_space<vmem>>, %arg3: memref<1x256xf32, #tpu.memory_space<vmem>>, %arg4: memref<1x256xf32, #tpu.memory_space<vmem>>, %arg5: memref<1xf32, #tpu.memory_space<smem>>, %arg6: memref<8x1xf32, #tpu.memory_space<vmem>>) attributes {dimension_semantics = [#tpu.dimension_semantics<parallel>], iteration_bounds = array<i64: 1>, scalar_prefetch = 0 : i64, scratch_operands = 0 : i64, tpu.core_type = #tpu.core_type<tc>, window_params = [{transform_indices = @transform_0, window_bounds = array<i64: 8, 768>}, {pipeline_mode = #tpu.pipeline_mode<synchronous>, transform_indices = @transform_1, window_bounds = array<i64: 768, 256>}, {pipeline_mode = #tpu.pipeline_mode<synchronous>, transform_indices = @transform_2, window_bounds = array<i64: 1, 256>}, {pipeline_mode = #tpu.pipeline_mode<synchronous>, transform_indices = @transform_3, window_bounds = array<i64: 1, 256>}, {transform_indices = @transform_4, window_bounds = array<i64: 1>}, {transform_indices = @transform_5, window_bounds = array<i64: 8, 1>}]} {
    %c0 = arith.constant 0 : index
    %c0_0 = arith.constant 0 : index
    %0 = vector.load %arg1[%c0, %c0_0] : memref<8x768xbf16, #tpu.memory_space<vmem>>, vector<8x768xbf16>
    %c0_1 = arith.constant 0 : index
    %c0_2 = arith.constant 0 : index
    %1 = vector.load %arg2[%c0_1, %c0_2] : memref<768x256xbf16, #tpu.memory_space<vmem>>, vector<768x256xbf16>
    %cst = arith.constant dense<0.000000e+00> : vector<8x256xf32>
    %2 = tpu.matmul %0, %1, %cst {dimension_numbers = #tpu.dot_dimension_numbers<[1], [0], [0], [1], [0, 0, 1, 1], [], []>} : vector<8x768xbf16>, vector<768x256xbf16>, vector<8x256xf32> -> vector<8x256xf32>
    %c0_3 = arith.constant 0 : index
    %c0_4 = arith.constant 0 : index
    %3 = vector.load %arg3[%c0_3, %c0_4] : memref<1x256xf32, #tpu.memory_space<vmem>>, vector<1x256xf32>
    %4 = vector.broadcast %3 : vector<1x256xf32> to vector<8x256xf32>
    %5 = arith.addf %2, %4 : vector<8x256xf32>
    %cst_5 = arith.constant 0.000000e+00 : f32
    %6 = vector.broadcast %cst_5 : f32 to vector<8x256xf32>
    %7 = arith.maximumf %5, %6 : vector<8x256xf32>
    %c0_6 = arith.constant 0 : index
    %c0_7 = arith.constant 0 : index
    %8 = vector.load %arg4[%c0_6, %c0_7] : memref<1x256xf32, #tpu.memory_space<vmem>>, vector<1x256xf32>
    %9 = vector.broadcast %8 : vector<1x256xf32> to vector<8x256xf32>
    %10 = arith.mulf %7, %9 : vector<8x256xf32>
    %cst_8 = arith.constant dense<0.000000e+00> : vector<8xf32>
    %11 = vector.multi_reduction <add>, %10, %cst_8 [1] : vector<8x256xf32> to vector<8xf32>
    %12 = vector.shape_cast %11 : vector<8xf32> to vector<8x1xf32>
    %c0_9 = arith.constant 0 : index
    %13 = memref.load %arg5[%c0_9] : memref<1xf32, #tpu.memory_space<smem>>
    %14 = vector.broadcast %13 : f32 to vector<8x1xf32>
    %15 = arith.addf %12, %14 : vector<8x1xf32>
    %16 = arith.negf %15 : vector<8x1xf32>
    %17 = math.exp %16 : vector<8x1xf32>
    %cst_10 = arith.constant 1.000000e+00 : f32
    %18 = vector.broadcast %cst_10 : f32 to vector<8x1xf32>
    %19 = arith.addf %18, %17 : vector<8x1xf32>
    %20 = arith.divf %18, %19 : vector<8x1xf32>
    %c0_11 = arith.constant 0 : index
    %c0_12 = arith.constant 0 : index
    %21 = vector.load %arg6[%c0_11, %c0_12] : memref<8x1xf32, #tpu.memory_space<vmem>>, vector<8x1xf32>
    tpu.vector_store %arg6[%c0_11, %c0_12], %20 {strides = array<i32>} : memref<8x1xf32, #tpu.memory_space<vmem>>, vector<8x1xf32>,
    return
  }
  func.func @transform_0(%arg0: i32) -> (i32, i32) {
    %c0_i32 = arith.constant 0 : i32
    %c0_i32_0 = arith.constant 0 : i32
    return %arg0, %c0_i32 : i32, i32
  }
  func.func @transform_1(%arg0: i32) -> (i32, i32) {
    %c0_i32 = arith.constant 0 : i32
    %c0_i32_0 = arith.constant 0 : i32
    %c0_i32_1 = arith.constant 0 : i32
    return %c0_i32, %c0_i32_0 : i32, i32
  }
  func.func @transform_2(%arg0: i32) -> (i32, i32) {
    %c0_i32 = arith.constant 0 : i32
    %c0_i32_0 = arith.constant 0 : i32
    %c0_i32_1 = arith.constant 0 : i32
    return %c0_i32, %c0_i32_0 : i32, i32
  }
  func.func @transform_3(%arg0: i32) -> (i32, i32) {
    %c0_i32 = arith.constant 0 : i32
    %c0_i32_0 = arith.constant 0 : i32
    %c0_i32_1 = arith.constant 0 : i32
    return %c0_i32, %c0_i32_0 : i32, i32
  }
  func.func @transform_4(%arg0: i32) -> i32 {
    %c0_i32 = arith.constant 0 : i32
    %c0_i32_0 = arith.constant 0 : i32
    return %c0_i32 : i32
  }
  func.func @transform_5(%arg0: i32) -> (i32, i32) {
    %c0_i32 = arith.constant 0 : i32
    %c0_i32_0 = arith.constant 0 : i32
    return %arg0, %c0_i32 : i32, i32
  }
}

</mosaic_0001>

<bundles_post_ra>
// kernel: tpu_custom_call.1
= control target key start
LH: loop header
LB: loop body
LE: loop exit
PB: predicated region body
PF: predicated region fallthrough
CT: control target
= control target key end

     0   :  { %11 = vsyncpa [#allocation4], 0  ;;  %s1181_s0 = inlined_call_operand.hbm [shape: bf16[8,768], index: 0, kind: input, shape index: {}]   ;;  %s1182_s1 = inlined_call_operand.hbm [shape: bf16[768,256], index: 1, kind: input, shape index: {}]   ;;  %s1183_s2 = inlined_call_operand.vmem [shape: f32[1,256], index: 2, kind: input, shape index: {}]   ;;  %s1184_s3 = inlined_call_operand.vmem [shape: f32[1,256], index: 3, kind: input, shape index: {}]   ;;  %s1185_s4 = inlined_call_operand.<no memory space> [shape: f32[1], index: 4, kind: input, shape index: {}]   ;;  %s1186_s5 = inlined_call_operand.vmem [shape: f32[8,1], index: 5, kind: output, shape index: {}]  }
   0x1   :  { %12 = vsyncpa [#allocation6], 0  ;;  %s1123_s18 = smov [#allocation3]   ;;  %s1124_s20 = smov [#allocation5]  }
   0x2   :  { %s19_s19 = sshll.u32 %s1123_s18, 4  ;;  %s28_s21 = sshll.u32 %s1124_s20, 4  ;;  %s20_s19 = int_to_ptr.vmem [resolvable:$true] %s19_s19  ;;  %s29_s21 = int_to_ptr.vmem [resolvable:$true] %s28_s21 }
   0x3   :  { %s1087_s22 = scalar_lea.vmem %s20_s19, 384  ;;  %p1092_p1 = scmp.lt.s32.totalorder %s20_s19, %s20_s19 }
   0x4   :  { %p1088_p0 = scmp.ne.s32.totalorder %s20_s19, %s1087_s22  ;;  %p1093_p2 = scmp.lt.s32.totalorder %s1087_s22, %s1087_s22 }
   0x6   :  { %p1094_p3 = por %p1093_p2, %p1092_p1 }
   0x8   :  { %p1095_p4 = pnand %p1094_p3, %p1088_p0 }
   0xa   :  { %1098 = shalt.err (!%p1095_p4)
}
   0xb   :  { %22 = dma.hbm_to_vmem [thread:$0]  %s1181_s0, 384, %s20_s19, [#allocation4]  }
   0xc   :  { %s1107_s25 = scalar_lea.vmem %s29_s21, 12288  ;;  %p1112_p6 = scmp.lt.s32.totalorder %s29_s21, %s29_s21 }
   0xd   :  { %p1108_p5 = scmp.ne.s32.totalorder %s29_s21, %s1107_s25  ;;  %p1113_p7 = scmp.lt.s32.totalorder %s1107_s25, %s1107_s25 }
   0xf   :  { %p1114_p8 = por %p1113_p7, %p1112_p6 }
  0x11   :  { %p1115_p9 = pnand %p1114_p8, %p1108_p5 }
  0x13   :  { %1118 = shalt.err (!%p1115_p9)
}
  0x14   :  { %s1125_s26 = smov 128   ;;  %s1126_s27 = smov 8  }
  0x15   :  { %34 = dma.hbm_to_vmem [thread:$0]  %s1182_s1, 12288, %s29_s21, [#allocation6], %s1125_s26, %s1125_s26, %s1126_s27  }
  0x16   :  { %1119 = dma.done.wait [#allocation4], 384  }
  0x17   :  { %1120 = vsyncadd [#allocation4], 4294966912 }
  0x18   :  { %1121 = dma.done.wait [#allocation6], 12288  }
  0x19   :  { %1122 = vsyncadd [#allocation6], 4294955008  ;;  %v925_v0 = vld [vmem:[#allocation5 + $0x74] ss:$8 sps:$4 sm:$0xff]   ;;  %v927_v1 = vld [vmem:[#allocation5 + $0x70] ss:$8 sps:$4 sm:$0xff]  }
  0x1a   :  { %659 = vmatprep.subr.bf16.mxu0 %v925_v0  ;;  %v928_v2 = vld [vmem:[#allocation5 + $0x174] ss:$8 sps:$4 sm:$0xff]   ;;  %v930_v3 = vld [vmem:[#allocation5 + $0x170] ss:$8 sps:$4 sm:$0xff]   ;;  %v931_v4 = vld [vmem:[#allocation5 + $0x64] ss:$8 sps:$4 sm:$0xff]  }
  0x1b   :  { %660 = vmatpush1.bf16.msra.mxu0 %v927_v1  ;;  %v933_v5 = vld [vmem:[#allocation5 + $0x60] ss:$8 sps:$4 sm:$0xff]   ;;  %700 = vmatprep.subr.bf16.mxu1 %v928_v2  ;;  %v934_v6 = vld [vmem:[#allocation5 + $0x164] ss:$8 sps:$4 sm:$0xff]   ;;  %v937_v8 = vld [vmem:[#allocation5 + $0x54] ss:$8 sps:$4 sm:$0xff]  }
  0x1c   :  { %701 = vmatpush1.bf16.msra.mxu1 %v930_v3  ;;  %661 = vmatprep.subr.bf16.mxu0 %v931_v4  ;;  %v936_v7 = vld [vmem:[#allocation5 + $0x160] ss:$8 sps:$4 sm:$0xff]   ;;  %v939_v9 = vld [vmem:[#allocation5 + $0x50] ss:$8 sps:$4 sm:$0xff]   ;;  %v940_v10 = vld [vmem:[#allocation5 + $0x154] ss:$8 sps:$4 sm:$0xff]  }
  0x1d   :  { %702 = vmatprep.subr.bf16.mxu1 %v934_v6  ;;  %v943_v11 = vld [vmem:[#allocation5 + $0x44] ss:$8 sps:$4 sm:$0xff]   ;;  %v942_v12 = vld [vmem:[#allocation5 + $0x150] ss:$8 sps:$4 sm:$0xff]   ;;  %v945_v14 = vld [vmem:[#allocation5 + $0x40] ss:$8 sps:$4 sm:$0xff]  }
  0x1e   :  { %v946_v13 = vld [vmem:[#allocation5 + $0x144] ss:$8 sps:$4 sm:$0xff]   ;;  %v949_v15 = vld [vmem:[#allocation5 + $0x34] ss:$8 sps:$4 sm:$0xff]   ;;  %v948_v16 = vld [vmem:[#allocation5 + $0x140] ss:$8 sps:$4 sm:$0xff]  }
  0x1f   :  { %662 = vmatpush1.bf16.msra.mxu0 %v933_v5  ;;  %v952_v17 = vld [vmem:[#allocation5 + $0x134] ss:$8 sps:$4 sm:$0xff]   ;;  %v951_v18 = vld [vmem:[#allocation5 + $0x30] ss:$8 sps:$4 sm:$0xff]   ;;  %v955_v19 = vld [vmem:[#allocation5 + $0x24] ss:$8 sps:$4 sm:$0xff]  }
  0x20   :  { %663 = vmatprep.subr.bf16.mxu0 %v937_v8  ;;  %703 = vmatpush1.bf16.msra.mxu1 %v936_v7  ;;  %v954_v20 = vld [vmem:[#allocation5 + $0x130] ss:$8 sps:$4 sm:$0xff]   ;;  %v958_v21 = vld [vmem:[#allocation5 + $0x124] ss:$8 sps:$4 sm:$0xff]   ;;  %v957_v22 = vld [vmem:[#allocation5 + $0x20] ss:$8 sps:$4 sm:$0xff]  }
  0x21   :  { %704 = vmatprep.subr.bf16.mxu1 %v940_v10  ;;  %v961_v23 = vld [vmem:[#allocation5 + $0x14] ss:$8 sps:$4 sm:$0xff]   ;;  %v960_v24 = vld [vmem:[#allocation5 + $0x120] ss:$8 sps:$4 sm:$0xff]   ;;  %v963_v26 = vld [vmem:[#allocation5 + $0x10] ss:$8 sps:$4 sm:$0xff]  }
  0x22   :  { %v964_v25 = vld [vmem:[#allocation5 + $0x114] ss:$8 sps:$4 sm:$0xff]   ;;  %v967_v27 = vld [vmem:[#allocation5 + $0x4] ss:$8 sps:$4 sm:$0xff]   ;;  %v966_v28 = vld [vmem:[#allocation5 + $0x110] ss:$8 sps:$4 sm:$0xff]  }
  0x23   :  { %664 = vmatpush1.bf16.msra.mxu0 %v939_v9  ;;  %v970_v29 = vld [vmem:[#allocation5 + $0x104] ss:$8 sps:$4 sm:$0xff]   ;;  %v969_v30 = vld [vmem:[#allocation5] ss:$8 sps:$4 sm:$0xff]   ;;  %v973_v31 = vld [vmem:[#allocation5 + $0xf4] ss:$8 sps:$4 sm:$0xff]  }
  0x24   :  { %665 = vmatprep.subr.bf16.mxu0 %v943_v11  ;;  %705 = vmatpush1.bf16.msra.mxu1 %v942_v12  ;;  %v972_v32 = vld [vmem:[#allocation5 + $0x100] ss:$8 sps:$4 sm:$0xff]   ;;  %v976_v33 = vld [vmem:[#allocation5 + $0x1f4] ss:$8 sps:$4 sm:$0xff]   ;;  %v975_v34 = vld [vmem:[#allocation5 + $0xf0] ss:$8 sps:$4 sm:$0xff]  }
  0x25   :  { %706 = vmatprep.subr.bf16.mxu1 %v946_v13  ;;  %v979_v35 = vld [vmem:[#allocation5 + $0xe4] ss:$8 sps:$4 sm:$0xff]   ;;  %v978_v36 = vld [vmem:[#allocation5 + $0x1f0] ss:$8 sps:$4 sm:$0xff]   ;;  %v981_v38 = vld [vmem:[#allocation5 + $0xe0] ss:$8 sps:$4 sm:$0xff]  }
  0x26   :  { %v982_v37 = vld [vmem:[#allocation5 + $0x1e4] ss:$8 sps:$4 sm:$0xff]   ;;  %v985_v39 = vld [vmem:[#allocation5 + $0xd4] ss:$8 sps:$4 sm:$0xff]   ;;  %v984_v40 = vld [vmem:[#allocation5 + $0x1e0] ss:$8 sps:$4 sm:$0xff]  }
  0x27   :  { %666 = vmatpush1.bf16.msra.mxu0 %v945_v14  ;;  %v988_v41 = vld [vmem:[#allocation5 + $0x1d4] ss:$8 sps:$4 sm:$0xff]   ;;  %v987_v42 = vld [vmem:[#allocation5 + $0xd0] ss:$8 sps:$4 sm:$0xff]   ;;  %v991_v43 = vld [vmem:[#allocation5 + $0xc4] ss:$8 sps:$4 sm:$0xff]  }
  0x28   :  { %667 = vmatprep.subr.bf16.mxu0 %v949_v15  ;;  %707 = vmatpush1.bf16.msra.mxu1 %v948_v16  ;;  %v990_v44 = vld [vmem:[#allocation5 + $0x1d0] ss:$8 sps:$4 sm:$0xff]   ;;  %v994_v45 = vld [vmem:[#allocation5 + $0x1c4] ss:$8 sps:$4 sm:$0xff]   ;;  %v993_v47 = vld [vmem:[#allocation5 + $0xc0] ss:$8 sps:$4 sm:$0xff]  }
  0x29   :  { %708 = vmatprep.subr.bf16.mxu1 %v952_v17  ;;  %v47_v46 = vld [vmem:[#allocation3] sm:$0xff]  ;;  %v997_v49 = vld [vmem:[#allocation5 + $0xb4] ss:$8 sps:$4 sm:$0xff]   ;;  %v999_v54 = vld [vmem:[#allocation5 + $0xb0] ss:$8 sps:$4 sm:$0xff]   ;;  %vm810_vm0 = vcmask 7168  }
  0x2a   :  { %v819_v48 = vcombine.high %v47_v46, %v47_v46  ;;  %v48_v50 = vld [vmem:[#allocation3 + $0x8] sm:$0xff]  ;;  %v996_v51 = vld [vmem:[#allocation5 + $0x1c0] ss:$8 sps:$4 sm:$0xff]   ;;  %v1003_v55 = vld [vmem:[#allocation5 + $0xa4] ss:$8 sps:$4 sm:$0xff]   ;;  %v818_v5 = vcombine.low %v47_v46, %v47_v46 }
  0x2b   :  { %668 = vmatpush1.bf16.msra.mxu0 %v951_v18  ;;  %v821_v52 = vcombine.high %v48_v50, %v48_v50  ;;  %v1000_v53 = vld [vmem:[#allocation5 + $0x1b4] ss:$8 sps:$4 sm:$0xff]   ;;  %v1002_v56 = vld [vmem:[#allocation5 + $0x1b0] ss:$8 sps:$4 sm:$0xff]   ;;  %v1006_v57 = vld [vmem:[#allocation5 + $0x1a4] ss:$8 sps:$4 sm:$0xff]   ;;  %v820_v7 = vcombine.low %v48_v50, %v48_v50 }
  0x2c   :  { %669 = vmatprep.subr.bf16.mxu0 %v955_v19  ;;  %709 = vmatpush1.bf16.msra.mxu1 %v954_v20  ;;  %v1005_v58 = vld [vmem:[#allocation5 + $0xa0] ss:$8 sps:$4 sm:$0xff]   ;;  %v1009_v59 = vld [vmem:[#allocation5 + $0x94] ss:$8 sps:$4 sm:$0xff]   ;;  %v1011_v62 = vld [vmem:[#allocation5 + $0x90] ss:$8 sps:$4 sm:$0xff]  }
  0x2d   :  { %710 = vmatprep.subr.bf16.mxu1 %v958_v21  ;;  %691 = vmatprep.mubr.bf16.mxu0 %v819_v48  ;;  %v1008_v60 = vld [vmem:[#allocation5 + $0x1a0] ss:$8 sps:$4 sm:$0xff]   ;;  %v1012_v61 = vld [vmem:[#allocation5 + $0x194] ss:$8 sps:$4 sm:$0xff]   ;;  %v1015_v63 = vld [vmem:[#allocation5 + $0x84] ss:$8 sps:$4 sm:$0xff]  }
  0x2e   :  { %732 = vmatprep.mubr.bf16.mxu1 %v821_v52  ;;  %v1014_v0 = vld [vmem:[#allocation5 + $0x190] ss:$8 sps:$4 sm:$0xff]   ;;  %v1018_v1 = vld [vmem:[#allocation5 + $0x184] ss:$8 sps:$4 sm:$0xff]   ;;  %v1017_v2 = vld [vmem:[#allocation5 + $0x80] ss:$8 sps:$4 sm:$0xff]  }
  0x2f   :  { %670 = vmatpush1.bf16.msra.mxu0 %v957_v22  ;;  %v1025_v3 = vld [vmem:[#allocation5 + $0x274] ss:$8 sps:$4 sm:$0xff]   ;;  %v1022_v4 = vld [vmem:[#allocation5 + $0x180] ss:$8 sps:$4 sm:$0xff]   ;;  %v1023_v6 = vld [vmem:[#allocation5 + $0x270] ss:$8 sps:$4 sm:$0xff]  }
  0x30   :  { %671 = vmatprep.subr.bf16.mxu0 %v961_v23  ;;  %711 = vmatpush1.bf16.msra.mxu1 %v960_v24  ;;  %v1030_v8 = vld [vmem:[#allocation5 + $0x264] ss:$8 sps:$4 sm:$0xff]   ;;  %v1163_v9 = vld [vmem:[#allocation3 + $0x10] sm:$0xff]  ;;  %v1028_v11 = vld [vmem:[#allocation5 + $0x260] ss:$8 sps:$4 sm:$0xff]  }
  0x31   :  { %712 = vmatprep.subr.bf16.mxu1 %v964_v25  ;;  %v823_v10 = vcombine.high %v1163_v9, %v1163_v9  ;;  %v1033_v12 = vld [vmem:[#allocation5 + $0x254] ss:$8 sps:$4 sm:$0xff]   ;;  %v1031_v13 = vld [vmem:[#allocation5 + $0x250] ss:$8 sps:$4 sm:$0xff]   ;;  %v1036_v14 = vld [vmem:[#allocation5 + $0x244] ss:$8 sps:$4 sm:$0xff]  }
  0x32   :  { %v1034_v15 = vld [vmem:[#allocation5 + $0x240] ss:$8 sps:$4 sm:$0xff]   ;;  %v1039_v16 = vld [vmem:[#allocation5 + $0x234] ss:$8 sps:$4 sm:$0xff]   ;;  %v1037_v17 = vld [vmem:[#allocation5 + $0x230] ss:$8 sps:$4 sm:$0xff]  }
  0x33   :  { %672 = vmatpush1.bf16.msra.mxu0 %v963_v26  ;;  %v1042_v18 = vld [vmem:[#allocation5 + $0x224] ss:$8 sps:$4 sm:$0xff]   ;;  %v1040_v19 = vld [vmem:[#allocation5 + $0x220] ss:$8 sps:$4 sm:$0xff]   ;;  %v1045_v20 = vld [vmem:[#allocation5 + $0x214] ss:$8 sps:$4 sm:$0xff]  }
  0x34   :  { %673 = vmatprep.subr.bf16.mxu0 %v967_v27  ;;  %713 = vmatpush1.bf16.msra.mxu1 %v966_v28  ;;  %v1043_v21 = vld [vmem:[#allocation5 + $0x210] ss:$8 sps:$4 sm:$0xff]   ;;  %v1048_v22 = vld [vmem:[#allocation5 + $0x204] ss:$8 sps:$4 sm:$0xff]   ;;  %v1046_v23 = vld [vmem:[#allocation5 + $0x200] ss:$8 sps:$4 sm:$0xff]  }
  0x35   :  { %714 = vmatprep.subr.bf16.mxu1 %v970_v29  ;;  %v1051_v24 = vld [vmem:[#allocation5 + $0x2f4] ss:$8 sps:$4 sm:$0xff]   ;;  %v1049_v25 = vld [vmem:[#allocation5 + $0x2f0] ss:$8 sps:$4 sm:$0xff]   ;;  %v1054_v26 = vld [vmem:[#allocation5 + $0x2e4] ss:$8 sps:$4 sm:$0xff]  }
  0x36   :  { %v1052_v27 = vld [vmem:[#allocation5 + $0x2e0] ss:$8 sps:$4 sm:$0xff]   ;;  %v1057_v28 = vld [vmem:[#allocation5 + $0x2d4] ss:$8 sps:$4 sm:$0xff]   ;;  %v1055_v29 = vld [vmem:[#allocation5 + $0x2d0] ss:$8 sps:$4 sm:$0xff]  }
  0x37   :  { %674 = vmatpush1.bf16.msra.mxu0 %v969_v30  ;;  %v1060_v30 = vld [vmem:[#allocation5 + $0x2c4] ss:$8 sps:$4 sm:$0xff]   ;;  %v146_v52 = vld [vmem:[%s1183_s2] sm:$0x3] }
  0x38   :  { %675 = vmatprep.subr.bf16.mxu0 %v973_v31  ;;  %715 = vmatpush1.bf16.msra.mxu1 %v972_v32  ;;  %v1058_v31 = vld [vmem:[#allocation5 + $0x2c0] ss:$8 sps:$4 sm:$0xff]   ;;  %v1063_v32 = vld [vmem:[#allocation5 + $0x2b4] ss:$8 sps:$4 sm:$0xff]  }
  0x39   :  { %716 = vmatprep.subr.bf16.mxu1 %v976_v33  ;;  %v1061_v33 = vld [vmem:[#allocation5 + $0x2b0] ss:$8 sps:$4 sm:$0xff]  }
  0x3b   :  { %676 = vmatpush2.bf16.msra.mxu0 %v975_v34  ;;  %v1066_v34 = vld [vmem:[#allocation5 + $0x2a4] ss:$8 sps:$4 sm:$0xff]  }
  0x3c   :  { %677 = vmatprep.subr.bf16.mxu0 %v979_v35  ;;  %717 = vmatpush2.bf16.msra.mxu1 %v978_v36  ;;  %v1064_v35 = vld [vmem:[#allocation5 + $0x2a0] ss:$8 sps:$4 sm:$0xff]   ;;  %v1069_v36 = vld [vmem:[#allocation5 + $0x294] ss:$8 sps:$4 sm:$0xff]  }
  0x3d   :  { %718 = vmatprep.subr.bf16.mxu1 %v982_v37  ;;  %v1067_v37 = vld [vmem:[#allocation5 + $0x290] ss:$8 sps:$4 sm:$0xff]  }
  0x3f   :  { %678 = vmatpush2.bf16.msra.mxu0 %v981_v38  ;;  %v1072_v38 = vld [vmem:[#allocation5 + $0x284] ss:$8 sps:$4 sm:$0xff]  }
  0x40   :  { %679 = vmatprep.subr.bf16.mxu0 %v985_v39  ;;  %719 = vmatpush2.bf16.msra.mxu1 %v984_v40  ;;  %v1070_v39 = vld [vmem:[#allocation5 + $0x280] ss:$8 sps:$4 sm:$0xff]   ;;  %v822_v40 = vcombine.low %v1163_v9, %v1163_v9 }
  0x41   :  { %720 = vmatprep.subr.bf16.mxu1 %v988_v41 }
  0x43   :  { %680 = vmatpush2.bf16.msra.mxu0 %v987_v42 }
  0x44   :  { %681 = vmatprep.subr.bf16.mxu0 %v991_v43  ;;  %721 = vmatpush2.bf16.msra.mxu1 %v990_v44 }
  0x45   :  { %722 = vmatprep.subr.bf16.mxu1 %v994_v45 }
  0x47   :  { %682 = vmatpush2.bf16.msra.mxu0 %v993_v47 }
  0x48   :  { %683 = vmatprep.subr.bf16.mxu0 %v997_v49  ;;  %723 = vmatpush2.bf16.msra.mxu1 %v996_v51  ;;  %v148_v49 = vlaneseq }
  0x49   :  { %724 = vmatprep.subr.bf16.mxu1 %v1000_v53 }
  0x4a   :  { %v149_v50 = vshrl.u32 %v148_v49, 7 }
  0x4b   :  { %684 = vmatpush2.bf16.msra.mxu0 %v999_v54 }
  0x4c   :  { %685 = vmatprep.subr.bf16.mxu0 %v1003_v55  ;;  %725 = vmatpush2.bf16.msra.mxu1 %v1002_v56  ;;  %v150_v51 = vsub.s32 0, %v149_v50  ;;  %v154_v53 = vsub.s32 1, %v149_v50 }
  0x4d   :  { %726 = vmatprep.subr.bf16.mxu1 %v1006_v57 }
  0x4e   :  { %v151_v54 = vrot.slane %v146_v52, %v150_v51  ;;  %v155_v55 = vrot.slane %v146_v52, %v154_v53 }
  0x4f   :  { %686 = vmatpush2.bf16.msra.mxu0 %v1005_v58 }
  0x50   :  { %687 = vmatprep.subr.bf16.mxu0 %v1009_v59  ;;  %727 = vmatpush2.bf16.msra.mxu1 %v1008_v60  ;;  %v784_v60 = vld [vmem:[%s1184_s3] sm:$0x3] }
  0x51   :  { %728 = vmatprep.subr.bf16.mxu1 %v1012_v61 }
  0x53   :  { %688 = vmatpush2.bf16.msra.mxu0 %v1011_v62 }
  0x54   :  { %689 = vmatprep.subr.bf16.mxu0 %v1015_v63  ;;  %729 = vmatpush2.bf16.msra.mxu1 %v1014_v0 }
  0x55   :  { %730 = vmatprep.subr.bf16.mxu1 %v1018_v1 }
  0x57   :  { %690 = vmatpush2.bf16.msra.mxu0 %v1017_v2  ;;  %v789_v2 = vrot.slane %v784_v60, %v150_v51 }
  0x58   :  { %741 = vmatprep.subr.bf16.mxu0 %v1025_v3  ;;  %731 = vmatpush2.bf16.msra.mxu1 %v1022_v4  ;;  %v793_v3 = vrot.slane %v784_v60, %v154_v53 }
  0x5a   :  { %692 = vmatmul.mubr.bf16.vlgmr.msra.gmra.mxu0 %v818_v5 }
  0x5b   :  { %742 = vmatpush1.bf16.msra.mxu0 %v1023_v6  ;;  %773 = vmatprep.mubr.bf16.mxu0 %v823_v10  ;;  %v802_v10 = vstv %s1185_s4 }
  0x5c   :  { %733 = vmatmul.mubr.bf16.vlgmr.msra.gmra.mxu1 %v820_v7  ;;  %743 = vmatprep.subr.bf16.mxu0 %v1030_v8 }
  0x5f   :  { %744 = vmatpush1.bf16.msra.mxu0 %v1028_v11 }
  0x60   :  { %745 = vmatprep.subr.bf16.mxu0 %v1033_v12 }
  0x63   :  { %746 = vmatpush1.bf16.msra.mxu0 %v1031_v13 }
  0x64   :  { %747 = vmatprep.subr.bf16.mxu0 %v1036_v14 }
  0x67   :  { %748 = vmatpush1.bf16.msra.mxu0 %v1034_v15 }
  0x68   :  { %749 = vmatprep.subr.bf16.mxu0 %v1039_v16 }
  0x6b   :  { %750 = vmatpush1.bf16.msra.mxu0 %v1037_v17 }
  0x6c   :  { %751 = vmatprep.subr.bf16.mxu0 %v1042_v18 }
  0x6f   :  { %752 = vmatpush1.bf16.msra.mxu0 %v1040_v19 }
  0x70   :  { %753 = vmatprep.subr.bf16.mxu0 %v1045_v20 }
  0x73   :  { %754 = vmatpush1.bf16.msra.mxu0 %v1043_v21 }
  0x74   :  { %755 = vmatprep.subr.bf16.mxu0 %v1048_v22 }
  0x77   :  { %756 = vmatpush1.bf16.msra.mxu0 %v1046_v23 }
  0x78   :  { %757 = vmatprep.subr.bf16.mxu0 %v1051_v24 }
  0x7b   :  { %758 = vmatpush2.bf16.msra.mxu0 %v1049_v25 }
  0x7c   :  { %759 = vmatprep.subr.bf16.mxu0 %v1054_v26 }
  0x7f   :  { %760 = vmatpush2.bf16.msra.mxu0 %v1052_v27 }
  0x80   :  { %761 = vmatprep.subr.bf16.mxu0 %v1057_v28 }
  0x83   :  { %762 = vmatpush2.bf16.msra.mxu0 %v1055_v29 }
  0x84   :  { %763 = vmatprep.subr.bf16.mxu0 %v1060_v30 }
  0x87   :  { %764 = vmatpush2.bf16.msra.mxu0 %v1058_v31 }
  0x88   :  { %765 = vmatprep.subr.bf16.mxu0 %v1063_v32 }
  0x8b   :  { %766 = vmatpush2.bf16.msra.mxu0 %v1061_v33 }
  0x8c   :  { %767 = vmatprep.subr.bf16.mxu0 %v1066_v34 }
  0x8f   :  { %768 = vmatpush2.bf16.msra.mxu0 %v1064_v35 }
  0x90   :  { %769 = vmatprep.subr.bf16.mxu0 %v1069_v36 }
  0x93   :  { %770 = vmatpush2.bf16.msra.mxu0 %v1067_v37 }
  0x94   :  { %771 = vmatprep.subr.bf16.mxu0 %v1072_v38 }
  0x97   :  { %772 = vmatpush2.bf16.msra.mxu0 %v1070_v39 }
  0x9a   :  { %774 = vmatmul.mubr.bf16.vlgmr.msra.gmra.mxu0 %v822_v40 }
 0x11a   :  { %v693_v41 = vpop.f32.mrf.mxu0 }
 0x11b   :  { %v694_v56 = vadd.f32 %v693_v41, %v151_v54 }
 0x11c   :  { %v695_v42 = vpop.f32.mrf.mxu0  ;;  %v734_v43 = vpop.f32.mrf.mxu1 }
 0x11d   :  { %v696_v57 = vadd.f32 %v695_v42, %v155_v55  ;;  %v735_v58 = vadd.f32 %v734_v43, %v694_v56 }
 0x11e   :  { %v697_v44 = vpop.f32.mrf.mxu0  ;;  %v736_v45 = vpop.f32.mrf.mxu1 }
 0x11f   :  { %v737_v61 = vadd.f32 %v736_v45, %v696_v57 }
 0x120   :  { %v698_v46 = vpop.f32.mrf.mxu0  ;;  %v738_v47 = vpop.f32.mrf.mxu1 }
 0x122   :  { %v739_v48 = vpop.f32.mrf.mxu1 }
 0x15a   :  { %v775_v59 = vpop.f32.mrf.mxu0 }
 0x15b   :  { %v776_v62 = vadd.f32 %v775_v59, %v735_v58 }
 0x15c   :  { %v777_v63 = vpop.f32.mrf.mxu0 }
 0x15d   :  { %v782_v0 = vmax.f32 %v776_v62, 0.0  ;;  %v778_v1 = vadd.f32 %v777_v63, %v737_v61 }
 0x15e   :  { %v779_v4 = vpop.f32.mrf.mxu0 }
 0x15f   :  { %v783_v5 = vmax.f32 %v778_v1, 0.0  ;;  %v796_v7 = vmul.f32 %v789_v2, %v782_v0 }
 0x160   :  { %v780_v6 = vpop.f32.mrf.mxu0 }
 0x161   :  { %v797_v8 = vmul.f32 %v793_v3, %v783_v5 }
 0x163   :  { %v798_v9 = vadd.f32 %v797_v8, %v796_v7 }
 0x165   :  { %799 = vadd.xlane.f32.xlu0 %v798_v9 }
 0x1ee   :  { %v800_v11 = vpop.xlane.xlu0 %799 }
 0x1ef   :  { %v803_v12 = vadd.f32 %v802_v10, %v800_v11 }
 0x1f1   :  { %v920_v13 = vmul.f32 -1.442695, %v803_v12 }
 0x1f3   :  { %1075 = vpow2.f32 %v920_v13 }
 0x200   :  { %v1076_v14 = vpop.eup %1075 }
 0x201   :  { %v807_v15 = vadd.f32 1.0, %v1076_v14 }
 0x203   :  { %1077 = vrcp.f32 %v807_v15 }
 0x210   :  { %v1078_v16 = vpop.eup %1077 }
 0x211   :  { %811 = vst.msk [vmem:[%s1186_s5] sm:$0xff] %vm810_vm0, %v1078_v16 }
 0x212   :  { %816 = vsyncpa [#allocation4], 1 }
 0x213   :  { %817 = vsyncpa [#allocation6], 1 }

</bundles_post_ra>
